<compile_context>
chip_gen: v7x
topology: tpu7x:2x2x1
jax: 0.10.0
libtpu: 0.0.40
codegen_flags: <defaults>
</compile_context>

<pallas_src>
import functools

import jax
import jax.numpy as jnp
from jax import lax
from jax.experimental import pallas as pl
from jax.experimental.pallas import tpu as pltpu


def _round_up(x, m):
    return (x + m - 1) // m * m


def _embeddings_kernel(ids_ref,                 # (B*S_pad,) int32 in SMEM (scalar prefetch)
                       word_hbm,                # (V, H) word-emb table, HBM (pl.ANY)
                       pos_ref,                 # (TB, H) position rows for this tile (VMEM)
                       gamma_ref, beta_ref,     # (1, H) LayerNorm params
                       out_ref,                 # (TB, H) output tile (batch dim squeezed)
                       buf, sem,                # scratch: (2, TB, H) VMEM, DMA sems (2,)
                       *, TB, eps, U):
    n_s = pl.num_programs(1)
    step = pl.program_id(0) * n_s + pl.program_id(1)      # linear step (row-major)
    n_steps = pl.num_programs(0) * n_s
    slot = step % 2

    def issue_gather(step_idx, dst_slot):
        # Tile `step_idx` covers flattened ids[step_idx*TB : (step_idx+1)*TB]
        # (S_pad == n_s * TB, so batch-row boundaries line up exactly).
        base = step_idx * TB

        @pl.loop(0, TB // U)
        def _(i):
            r0 = i * U
            for u in range(U):                 # unrolled: U descriptors / iter
                r = r0 + u
                tok = ids_ref[base + r]
                pltpu.make_async_copy(
                    word_hbm.at[pl.ds(tok, 1), :],
                    buf.at[dst_slot, pl.ds(r, 1), :],
                    sem.at[dst_slot],
                ).start()

    # Cold start: only the very first grid step fetches its own tile.
    @pl.when(step == 0)
    def _():
        issue_gather(0, 0)

    # Prefetch the next tile (possibly crossing a batch-row boundary) BEFORE
    # waiting on the current slot: targets the other slot/semaphore, so it is
    # independent of the wait and overlaps with it and with the LayerNorm.
    @pl.when(step + 1 < n_steps)
    def _():
        issue_gather(step + 1, 1 - slot)

    # Single aggregate wait: DMA semaphores count bytes, so one wait sized
    # (TB, H) covers all TB single-row copies into this slot.
    pltpu.make_async_copy(buf.at[slot], buf.at[slot], sem.at[slot]).wait()

    # inputs_embeds + position_embeddings (f32 compute path; tables may be bf16)
    x = buf[slot].astype(jnp.float32) + pos_ref[...].astype(jnp.float32)

    # LayerNorm over hidden (biased variance, like torch.nn.LayerNorm)
    mean = jnp.mean(x, axis=-1, keepdims=True)
    xc = x - mean
    var = jnp.mean(xc * xc, axis=-1, keepdims=True)
    y = (xc * lax.rsqrt(var + eps) * gamma_ref[...].astype(jnp.float32)
         + beta_ref[...].astype(jnp.float32))

    # dropout == identity (eval mode)
    out_ref[...] = y.astype(out_ref.dtype)


def bert_generation_embeddings(input_ids, word_emb, pos_emb, gamma, beta,
                               *, past_key_values_length=0, eps=1e-12,
                               token_block=128, out_dtype=None):
    """input_ids: (B, S) int32; word_emb: (V, H); pos_emb: (P, H);
    gamma/beta: (H,).  Returns (B, S, H) in `out_dtype` (default word_emb.dtype)."""
    B, S = input_ids.shape
    V, H = word_emb.shape
    P, _ = pos_emb.shape
    pkvl = int(past_key_values_length)
    out_dtype = jnp.dtype(out_dtype or word_emb.dtype)

    # Token-tile size: multiple of 8 sublanes, capped by token_block.
    TB = _round_up(min(int(token_block), _round_up(S, 8)), 8)
    S_pad = _round_up(S, TB)
    n_s = S_pad // TB

    # Flattened ids for SMEM scalar prefetch (no 2D SMEM row padding).
    ids = input_ids.astype(jnp.int32)
    if S_pad != S:
        ids = jnp.pad(ids, ((0, 0), (0, S_pad - S)))       # pad with id 0 (valid row)
    ids_flat = ids.reshape(-1)                              # (B*S_pad,)

    # Contiguous position slab for this call: rows [pkvl, pkvl + S_pad).
    # Pad the table first so the slab is always in bounds; padded rows only
    # feed padded tokens, which are sliced off at the end.
    P_need = pkvl + S_pad
    if P_need > P:
        pos_emb = jnp.concatenate(
            [pos_emb, jnp.zeros((P_need - P, H), pos_emb.dtype)], axis=0)
    pos_slab = lax.slice_in_dim(pos_emb, pkvl, pkvl + S_pad, axis=0)   # (S_pad, H)

    gamma2 = gamma.reshape(1, H)
    beta2 = beta.reshape(1, H)

    # VMEM budget: gather double-buffer + streamed pos + output double-buffer.
    isz = lambda dt: jnp.dtype(dt).itemsize
    vmem_needed = (2 * TB * H * (isz(word_emb.dtype) + isz(pos_emb.dtype) + isz(out_dtype))
                   + 4 * H * isz(gamma.dtype))
    vmem_limit = int(min(max(2 * vmem_needed + (2 << 20), 32 << 20), 64 << 20))

    grid_spec = pltpu.PrefetchScalarGridSpec(
        num_scalar_prefetch=1,
        grid=(B, n_s),
        in_specs=[
            pl.BlockSpec(memory_space=pl.ANY),                       # word table (HBM)
            pl.BlockSpec((TB, H), lambda b, s, ids: (s, 0)),         # pos rows (streamed)
            pl.BlockSpec((1, H), lambda b, s, ids: (0, 0)),          # gamma
            pl.BlockSpec((1, H), lambda b, s, ids: (0, 0)),          # beta
        ],
        out_specs=pl.BlockSpec((None, TB, H), lambda b, s, ids: (b, s, 0)),
        scratch_shapes=[
            pltpu.VMEM((2, TB, H), word_emb.dtype),     # double-buffered gather scratch
            pltpu.SemaphoreType.DMA((2,)),              # one DMA sem per buffer slot
        ],
    )

    out = pl.pallas_call(
        functools.partial(_embeddings_kernel, TB=TB, eps=float(eps), U=4),
        out_shape=jax.ShapeDtypeStruct((B, S_pad, H), out_dtype),
        grid_spec=grid_spec,
        compiler_params=pltpu.CompilerParams(
            # Both axes sequential (row-major) so the double-buffer slot and
            # cross-row prefetch carry across batch rows.
            dimension_semantics=("arbitrary", "arbitrary"),
            vmem_limit_bytes=vmem_limit),
    )(ids_flat, word_emb, pos_slab, gamma2, beta2)

    return out[:, :S, :]


def _reference(input_ids, word_emb, pos_emb, gamma, beta,
               *, past_key_values_length=0, eps=1e-12):
    B, S = input_ids.shape
    pos_ids = jnp.arange(S) + past_key_values_length
    x = word_emb[input_ids] + pos_emb[pos_ids][None, :, :]
    mean = jnp.mean(x, axis=-1, keepdims=True)
    var = jnp.mean((x - mean) ** 2, axis=-1, keepdims=True)
    return (x - mean) * jax.lax.rsqrt(var + eps) * gamma + beta


if __name__ == "__main__":
    vocab_size = 64
    hidden_size = 128
    max_position_embeddings = 32
    pad_token_id = 0
    layer_norm_eps = 1e-12

    key = jax.random.PRNGKey(0)
    k_word, k_pos, k_ids1, k_ids2 = jax.random.split(key, 4)

    word_emb = 0.02 * jax.random.normal(k_word, (vocab_size, hidden_size), jnp.float32)
    word_emb = word_emb.at[pad_token_id].set(0.0)   # nn.Embedding padding_idx row is zero
    pos_emb = 0.02 * jax.random.normal(k_pos, (max_position_embeddings, hidden_size), jnp.float32)
    gamma = jnp.ones((hidden_size,), jnp.float32)
    beta = jnp.zeros((hidden_size,), jnp.float32)

    # Test 1: single tile per sequence (prefetch crosses batch rows only).
    batch, seq = 2, 8
    input_ids = jax.random.randint(k_ids1, (batch, seq), 0, vocab_size, jnp.int32)
    out = bert_generation_embeddings(input_ids, word_emb, pos_emb, gamma, beta,
                                     past_key_values_length=0, eps=layer_norm_eps)
    out = jax.block_until_ready(out)
    ref = _reference(input_ids, word_emb, pos_emb, gamma, beta,
                     past_key_values_length=0, eps=layer_norm_eps)
    assert out.shape == (batch, seq, hidden_size)
    assert jnp.allclose(out, ref, atol=1e-5, rtol=1e-5), "mismatch vs reference (test 1)"

    # Test 2: multiple seq tiles + cross-batch-row prefetch, non-zero
    # past_key_values_length, and a non-tile-aligned sequence length.
    batch2, seq2, pkvl2 = 2, 10, 4
    input_ids2 = jax.random.randint(k_ids2, (batch2, seq2), 0, vocab_size, jnp.int32)
    out2 = bert_generation_embeddings(input_ids2, word_emb, pos_emb, gamma, beta,
                                      past_key_values_length=pkvl2, eps=layer_norm_eps,
                                      token_block=8)
    out2 = jax.block_until_ready(out2)
    ref2 = _reference(input_ids2, word_emb, pos_emb, gamma, beta,
                      past_key_values_length=pkvl2, eps=layer_norm_eps)
    assert out2.shape == (batch2, seq2, hidden_size)
    assert jnp.allclose(out2, ref2, atol=1e-5, rtol=1e-5), "mismatch vs reference (test 2)"

    # Test 3: bf16 embedding tables (halves gather/writeback HBM bytes),
    # f32 output; kernel upcasts to f32 before the add + LayerNorm.
    word_bf16 = word_emb.astype(jnp.bfloat16)
    pos_bf16 = pos_emb.astype(jnp.bfloat16)
    out3 = bert_generation_embeddings(input_ids2, word_bf16, pos_bf16, gamma, beta,
                                      past_key_values_length=pkvl2, eps=layer_norm_eps,
                                      token_block=8, out_dtype=jnp.float32)
    out3 = jax.block_until_ready(out3)
    ref3 = _reference(input_ids2, word_bf16.astype(jnp.float32),
                      pos_bf16.astype(jnp.float32), gamma, beta,
                      past_key_values_length=pkvl2, eps=layer_norm_eps)
    assert out3.shape == (batch2, seq2, hidden_size)
    assert jnp.allclose(out3, ref3, atol=1e-4, rtol=1e-4), "mismatch vs reference (test 3)"

    print("KERNEL_OK")
</pallas_src>

<mosaic_0001>
module attributes {stable_mosaic.version = 11 : i64} {
  func.func @_embeddings_kernel(%arg0: i32, %arg1: i32, %arg2: memref<16xi32, #tpu.memory_space<smem>>, %arg3: memref<64x128xf32, #tpu.memory_space<any>>, %arg4: memref<8x128xf32, #tpu.memory_space<vmem>>, %arg5: memref<1x128xf32, #tpu.memory_space<vmem>>, %arg6: memref<1x128xf32, #tpu.memory_space<vmem>>, %arg7: memref<1x8x128xf32, #tpu.memory_space<vmem>>, %arg8: memref<2x8x128xf32, #tpu.memory_space<vmem>>, %arg9: memref<2x!tpu.dma_semaphore, #tpu.memory_space<semaphore_mem>>) attributes {dimension_semantics = [#tpu.dimension_semantics<arbitrary>, #tpu.dimension_semantics<arbitrary>], iteration_bounds = array<i64: 2, 1>, scalar_prefetch = 1 : i64, scratch_operands = 2 : i64, tpu.core_type = #tpu.core_type<tc>, window_params = [{}, {transform_indices = @transform_1, window_bounds = array<i64: 8, 128>}, {pipeline_mode = #tpu.pipeline_mode<synchronous>, transform_indices = @transform_2, window_bounds = array<i64: 1, 128>}, {pipeline_mode = #tpu.pipeline_mode<synchronous>, transform_indices = @transform_3, window_bounds = array<i64: 1, 128>}, {transform_indices = @transform_4, window_bounds = array<i64: 1, 8, 128>}]} {
    %c1_i32 = arith.constant 1 : i32
    %0 = arith.muli %arg0, %c1_i32 : i32
    %1 = arith.addi %0, %arg1 : i32
    %c2_i32 = arith.constant 2 : i32
    %c0_i32 = arith.constant 0 : i32
    %2 = arith.cmpi eq, %c2_i32, %c0_i32 : i32
    %c1_i32_0 = arith.constant 1 : i32
    %3 = arith.select %2, %c1_i32_0, %c2_i32 : i32
    %4 = arith.remsi %1, %3 : i32
    %c0_i32_1 = arith.constant 0 : i32
    %5 = arith.cmpi ne, %4, %c0_i32_1 : i32
    %c0_i32_2 = arith.constant 0 : i32
    %6 = arith.cmpi slt, %4, %c0_i32_2 : i32
    %c0_i32_3 = arith.constant 0 : i32
    %7 = arith.cmpi slt, %3, %c0_i32_3 : i32
    %8 = arith.xori %6, %7 : i1
    %9 = arith.andi %8, %5 : i1
    %10 = arith.addi %4, %3 : i32
    %11 = arith.select %9, %10, %4 : i32
    %c0_i32_4 = arith.constant 0 : i32
    %12 = arith.cmpi eq, %1, %c0_i32_4 : i32
    %13 = arith.extui %12 : i1 to i32
    %c0_i32_5 = arith.constant 0 : i32
    %14 = arith.cmpi ne, %13, %c0_i32_5 : i32
    scf.if %14 {
      %c0_i32_27 = arith.constant 0 : i32
      %c2_i32_28 = arith.constant 2 : i32
      %55 = arith.addi %c0_i32_27, %c2_i32_28 : i32
      %c1_i32_29 = arith.constant 1 : i32
      scf.for %arg10 = %c0_i32_27 to %55 step %c1_i32_29  : i32 {
        %c1_i32_31 = arith.constant 1 : i32
        %56 = arith.muli %arg10, %c1_i32_31 : i32
        %c0_i32_32 = arith.constant 0 : i32
        %57 = arith.addi %c0_i32_32, %56 : i32
        %c4_i32 = arith.constant 4 : i32
        %58 = arith.muli %57, %c4_i32 : i32
        %c0_i32_33 = arith.constant 0 : i32
        %59 = arith.addi %58, %c0_i32_33 : i32
        %c0_i32_34 = arith.constant 0 : i32
        %60 = arith.addi %c0_i32_34, %59 : i32
        %61 = arith.index_cast %60 : i32 to index
        %62 = memref.load %arg2[%61] : memref<16xi32, #tpu.memory_space<smem>>
        %c0_i32_35 = arith.constant 0 : i32
        %c0_i32_36 = arith.constant 0 : i32
        %c0_i32_37 = arith.constant 0 : i32
        %63 = tpu.memref_slice %arg3[%62, %c0_i32_37] : memref<64x128xf32, #tpu.memory_space<any>> -> memref<1x128xf32, #tpu.memory_space<any>>
        %c0_i32_38 = arith.constant 0 : i32
        %64 = tpu.memref_slice %arg8[%c0_i32_35, %59, %c0_i32_38] : memref<2x8x128xf32, #tpu.memory_space<vmem>> -> memref<1x1x128xf32, #tpu.memory_space<vmem>>
        %65 = tpu.memref_squeeze %64 : memref<1x1x128xf32, #tpu.memory_space<vmem>> -> memref<1x128xf32, #tpu.memory_space<vmem>>
        %66 = tpu.memref_slice %arg9[%c0_i32_36] : memref<2x!tpu.dma_semaphore, #tpu.memory_space<semaphore_mem>> -> memref<1x!tpu.dma_semaphore, #tpu.memory_space<semaphore_mem>>
        %67 = tpu.memref_squeeze %66 : memref<1x!tpu.dma_semaphore, #tpu.memory_space<semaphore_mem>> -> memref<!tpu.dma_semaphore, #tpu.memory_space<semaphore_mem>>
        tpu.enqueue_dma source(%63 : memref<1x128xf32, #tpu.memory_space<any>>) target(%65 : memref<1x128xf32, #tpu.memory_space<vmem>>) target_semaphore(%67 : memref<!tpu.dma_semaphore, #tpu.memory_space<semaphore_mem>>)
        %c1_i32_39 = arith.constant 1 : i32
        %68 = arith.addi %58, %c1_i32_39 : i32
        %c0_i32_40 = arith.constant 0 : i32
        %69 = arith.addi %c0_i32_40, %68 : i32
        %70 = arith.index_cast %69 : i32 to index
        %71 = memref.load %arg2[%70] : memref<16xi32, #tpu.memory_space<smem>>
        %c0_i32_41 = arith.constant 0 : i32
        %c0_i32_42 = arith.constant 0 : i32
        %c0_i32_43 = arith.constant 0 : i32
        %72 = tpu.memref_slice %arg3[%71, %c0_i32_43] : memref<64x128xf32, #tpu.memory_space<any>> -> memref<1x128xf32, #tpu.memory_space<any>>
        %c0_i32_44 = arith.constant 0 : i32
        %73 = tpu.memref_slice %arg8[%c0_i32_41, %68, %c0_i32_44] : memref<2x8x128xf32, #tpu.memory_space<vmem>> -> memref<1x1x128xf32, #tpu.memory_space<vmem>>
        %74 = tpu.memref_squeeze %73 : memref<1x1x128xf32, #tpu.memory_space<vmem>> -> memref<1x128xf32, #tpu.memory_space<vmem>>
        %75 = tpu.memref_slice %arg9[%c0_i32_42] : memref<2x!tpu.dma_semaphore, #tpu.memory_space<semaphore_mem>> -> memref<1x!tpu.dma_semaphore, #tpu.memory_space<semaphore_mem>>
        %76 = tpu.memref_squeeze %75 : memref<1x!tpu.dma_semaphore, #tpu.memory_space<semaphore_mem>> -> memref<!tpu.dma_semaphore, #tpu.memory_space<semaphore_mem>>
        tpu.enqueue_dma source(%72 : memref<1x128xf32, #tpu.memory_space<any>>) target(%74 : memref<1x128xf32, #tpu.memory_space<vmem>>) target_semaphore(%76 : memref<!tpu.dma_semaphore, #tpu.memory_space<semaphore_mem>>)
        %c2_i32_45 = arith.constant 2 : i32
        %77 = arith.addi %58, %c2_i32_45 : i32
        %c0_i32_46 = arith.constant 0 : i32
        %78 = arith.addi %c0_i32_46, %77 : i32
        %79 = arith.index_cast %78 : i32 to index
        %80 = memref.load %arg2[%79] : memref<16xi32, #tpu.memory_space<smem>>
        %c0_i32_47 = arith.constant 0 : i32
        %c0_i32_48 = arith.constant 0 : i32
        %c0_i32_49 = arith.constant 0 : i32
        %81 = tpu.memref_slice %arg3[%80, %c0_i32_49] : memref<64x128xf32, #tpu.memory_space<any>> -> memref<1x128xf32, #tpu.memory_space<any>>
        %c0_i32_50 = arith.constant 0 : i32
        %82 = tpu.memref_slice %arg8[%c0_i32_47, %77, %c0_i32_50] : memref<2x8x128xf32, #tpu.memory_space<vmem>> -> memref<1x1x128xf32, #tpu.memory_space<vmem>>
        %83 = tpu.memref_squeeze %82 : memref<1x1x128xf32, #tpu.memory_space<vmem>> -> memref<1x128xf32, #tpu.memory_space<vmem>>
        %84 = tpu.memref_slice %arg9[%c0_i32_48] : memref<2x!tpu.dma_semaphore, #tpu.memory_space<semaphore_mem>> -> memref<1x!tpu.dma_semaphore, #tpu.memory_space<semaphore_mem>>
        %85 = tpu.memref_squeeze %84 : memref<1x!tpu.dma_semaphore, #tpu.memory_space<semaphore_mem>> -> memref<!tpu.dma_semaphore, #tpu.memory_space<semaphore_mem>>
        tpu.enqueue_dma source(%81 : memref<1x128xf32, #tpu.memory_space<any>>) target(%83 : memref<1x128xf32, #tpu.memory_space<vmem>>) target_semaphore(%85 : memref<!tpu.dma_semaphore, #tpu.memory_space<semaphore_mem>>)
        %c3_i32 = arith.constant 3 : i32
        %86 = arith.addi %58, %c3_i32 : i32
        %c0_i32_51 = arith.constant 0 : i32
        %87 = arith.addi %c0_i32_51, %86 : i32
        %88 = arith.index_cast %87 : i32 to index
        %89 = memref.load %arg2[%88] : memref<16xi32, #tpu.memory_space<smem>>
        %c0_i32_52 = arith.constant 0 : i32
        %c0_i32_53 = arith.constant 0 : i32
        %c0_i32_54 = arith.constant 0 : i32
        %90 = tpu.memref_slice %arg3[%89, %c0_i32_54] : memref<64x128xf32, #tpu.memory_space<any>> -> memref<1x128xf32, #tpu.memory_space<any>>
        %c0_i32_55 = arith.constant 0 : i32
        %91 = tpu.memref_slice %arg8[%c0_i32_52, %86, %c0_i32_55] : memref<2x8x128xf32, #tpu.memory_space<vmem>> -> memref<1x1x128xf32, #tpu.memory_space<vmem>>
        %92 = tpu.memref_squeeze %91 : memref<1x1x128xf32, #tpu.memory_space<vmem>> -> memref<1x128xf32, #tpu.memory_space<vmem>>
        %93 = tpu.memref_slice %arg9[%c0_i32_53] : memref<2x!tpu.dma_semaphore, #tpu.memory_space<semaphore_mem>> -> memref<1x!tpu.dma_semaphore, #tpu.memory_space<semaphore_mem>>
        %94 = tpu.memref_squeeze %93 : memref<1x!tpu.dma_semaphore, #tpu.memory_space<semaphore_mem>> -> memref<!tpu.dma_semaphore, #tpu.memory_space<semaphore_mem>>
        tpu.enqueue_dma source(%90 : memref<1x128xf32, #tpu.memory_space<any>>) target(%92 : memref<1x128xf32, #tpu.memory_space<vmem>>) target_semaphore(%94 : memref<!tpu.dma_semaphore, #tpu.memory_space<semaphore_mem>>)
      }
      %c2_i32_30 = arith.constant 2 : i32
    } else {
    }
    %c1_i32_6 = arith.constant 1 : i32
    %15 = arith.addi %1, %c1_i32_6 : i32
    %c2_i32_7 = arith.constant 2 : i32
    %16 = arith.cmpi slt, %15, %c2_i32_7 : i32
    %17 = arith.extui %16 : i1 to i32
    %c0_i32_8 = arith.constant 0 : i32
    %18 = arith.cmpi ne, %17, %c0_i32_8 : i32
    scf.if %18 {
      %c1_i32_27 = arith.constant 1 : i32
      %55 = arith.addi %1, %c1_i32_27 : i32
      %c1_i32_28 = arith.constant 1 : i32
      %56 = arith.subi %c1_i32_28, %11 : i32
      %c8_i32 = arith.constant 8 : i32
      %57 = arith.muli %55, %c8_i32 : i32
      %c0_i32_29 = arith.constant 0 : i32
      %c2_i32_30 = arith.constant 2 : i32
      %58 = arith.addi %c0_i32_29, %c2_i32_30 : i32
      %c1_i32_31 = arith.constant 1 : i32
      scf.for %arg10 = %c0_i32_29 to %58 step %c1_i32_31  : i32 {
        %c1_i32_33 = arith.constant 1 : i32
        %59 = arith.muli %arg10, %c1_i32_33 : i32
        %c0_i32_34 = arith.constant 0 : i32
        %60 = arith.addi %c0_i32_34, %59 : i32
        %c4_i32 = arith.constant 4 : i32
        %61 = arith.muli %60, %c4_i32 : i32
        %c0_i32_35 = arith.constant 0 : i32
        %62 = arith.addi %61, %c0_i32_35 : i32
        %63 = arith.addi %57, %62 : i32
        %64 = arith.index_cast %63 : i32 to index
        %65 = memref.load %arg2[%64] : memref<16xi32, #tpu.memory_space<smem>>
        %c0_i32_36 = arith.constant 0 : i32
        %66 = tpu.memref_slice %arg3[%65, %c0_i32_36] : memref<64x128xf32, #tpu.memory_space<any>> -> memref<1x128xf32, #tpu.memory_space<any>>
        %c0_i32_37 = arith.constant 0 : i32
        %67 = tpu.memref_slice %arg8[%56, %62, %c0_i32_37] : memref<2x8x128xf32, #tpu.memory_space<vmem>> -> memref<1x1x128xf32, #tpu.memory_space<vmem>>
        %68 = tpu.memref_squeeze %67 : memref<1x1x128xf32, #tpu.memory_space<vmem>> -> memref<1x128xf32, #tpu.memory_space<vmem>>
        %69 = tpu.memref_slice %arg9[%56] : memref<2x!tpu.dma_semaphore, #tpu.memory_space<semaphore_mem>> -> memref<1x!tpu.dma_semaphore, #tpu.memory_space<semaphore_mem>>
        %70 = tpu.memref_squeeze %69 : memref<1x!tpu.dma_semaphore, #tpu.memory_space<semaphore_mem>> -> memref<!tpu.dma_semaphore, #tpu.memory_space<semaphore_mem>>
        tpu.enqueue_dma source(%66 : memref<1x128xf32, #tpu.memory_space<any>>) target(%68 : memref<1x128xf32, #tpu.memory_space<vmem>>) target_semaphore(%70 : memref<!tpu.dma_semaphore, #tpu.memory_space<semaphore_mem>>)
        %c1_i32_38 = arith.constant 1 : i32
        %71 = arith.addi %61, %c1_i32_38 : i32
        %72 = arith.addi %57, %71 : i32
        %73 = arith.index_cast %72 : i32 to index
        %74 = memref.load %arg2[%73] : memref<16xi32, #tpu.memory_space<smem>>
        %c0_i32_39 = arith.constant 0 : i32
        %75 = tpu.memref_slice %arg3[%74, %c0_i32_39] : memref<64x128xf32, #tpu.memory_space<any>> -> memref<1x128xf32, #tpu.memory_space<any>>
        %c0_i32_40 = arith.constant 0 : i32
        %76 = tpu.memref_slice %arg8[%56, %71, %c0_i32_40] : memref<2x8x128xf32, #tpu.memory_space<vmem>> -> memref<1x1x128xf32, #tpu.memory_space<vmem>>
        %77 = tpu.memref_squeeze %76 : memref<1x1x128xf32, #tpu.memory_space<vmem>> -> memref<1x128xf32, #tpu.memory_space<vmem>>
        %78 = tpu.memref_slice %arg9[%56] : memref<2x!tpu.dma_semaphore, #tpu.memory_space<semaphore_mem>> -> memref<1x!tpu.dma_semaphore, #tpu.memory_space<semaphore_mem>>
        %79 = tpu.memref_squeeze %78 : memref<1x!tpu.dma_semaphore, #tpu.memory_space<semaphore_mem>> -> memref<!tpu.dma_semaphore, #tpu.memory_space<semaphore_mem>>
        tpu.enqueue_dma source(%75 : memref<1x128xf32, #tpu.memory_space<any>>) target(%77 : memref<1x128xf32, #tpu.memory_space<vmem>>) target_semaphore(%79 : memref<!tpu.dma_semaphore, #tpu.memory_space<semaphore_mem>>)
        %c2_i32_41 = arith.constant 2 : i32
        %80 = arith.addi %61, %c2_i32_41 : i32
        %81 = arith.addi %57, %80 : i32
        %82 = arith.index_cast %81 : i32 to index
        %83 = memref.load %arg2[%82] : memref<16xi32, #tpu.memory_space<smem>>
        %c0_i32_42 = arith.constant 0 : i32
        %84 = tpu.memref_slice %arg3[%83, %c0_i32_42] : memref<64x128xf32, #tpu.memory_space<any>> -> memref<1x128xf32, #tpu.memory_space<any>>
        %c0_i32_43 = arith.constant 0 : i32
        %85 = tpu.memref_slice %arg8[%56, %80, %c0_i32_43] : memref<2x8x128xf32, #tpu.memory_space<vmem>> -> memref<1x1x128xf32, #tpu.memory_space<vmem>>
        %86 = tpu.memref_squeeze %85 : memref<1x1x128xf32, #tpu.memory_space<vmem>> -> memref<1x128xf32, #tpu.memory_space<vmem>>
        %87 = tpu.memref_slice %arg9[%56] : memref<2x!tpu.dma_semaphore, #tpu.memory_space<semaphore_mem>> -> memref<1x!tpu.dma_semaphore, #tpu.memory_space<semaphore_mem>>
        %88 = tpu.memref_squeeze %87 : memref<1x!tpu.dma_semaphore, #tpu.memory_space<semaphore_mem>> -> memref<!tpu.dma_semaphore, #tpu.memory_space<semaphore_mem>>
        tpu.enqueue_dma source(%84 : memref<1x128xf32, #tpu.memory_space<any>>) target(%86 : memref<1x128xf32, #tpu.memory_space<vmem>>) target_semaphore(%88 : memref<!tpu.dma_semaphore, #tpu.memory_space<semaphore_mem>>)
        %c3_i32 = arith.constant 3 : i32
        %89 = arith.addi %61, %c3_i32 : i32
        %90 = arith.addi %57, %89 : i32
        %91 = arith.index_cast %90 : i32 to index
        %92 = memref.load %arg2[%91] : memref<16xi32, #tpu.memory_space<smem>>
        %c0_i32_44 = arith.constant 0 : i32
        %93 = tpu.memref_slice %arg3[%92, %c0_i32_44] : memref<64x128xf32, #tpu.memory_space<any>> -> memref<1x128xf32, #tpu.memory_space<any>>
        %c0_i32_45 = arith.constant 0 : i32
        %94 = tpu.memref_slice %arg8[%56, %89, %c0_i32_45] : memref<2x8x128xf32, #tpu.memory_space<vmem>> -> memref<1x1x128xf32, #tpu.memory_space<vmem>>
        %95 = tpu.memref_squeeze %94 : memref<1x1x128xf32, #tpu.memory_space<vmem>> -> memref<1x128xf32, #tpu.memory_space<vmem>>
        %96 = tpu.memref_slice %arg9[%56] : memref<2x!tpu.dma_semaphore, #tpu.memory_space<semaphore_mem>> -> memref<1x!tpu.dma_semaphore, #tpu.memory_space<semaphore_mem>>
        %97 = tpu.memref_squeeze %96 : memref<1x!tpu.dma_semaphore, #tpu.memory_space<semaphore_mem>> -> memref<!tpu.dma_semaphore, #tpu.memory_space<semaphore_mem>>
        tpu.enqueue_dma source(%93 : memref<1x128xf32, #tpu.memory_space<any>>) target(%95 : memref<1x128xf32, #tpu.memory_space<vmem>>) target_semaphore(%97 : memref<!tpu.dma_semaphore, #tpu.memory_space<semaphore_mem>>)
      }
      %c2_i32_32 = arith.constant 2 : i32
    } else {
    }
    %c0_i32_9 = arith.constant 0 : i32
    %c0_i32_10 = arith.constant 0 : i32
    %19 = tpu.memref_slice %arg8[%11, %c0_i32_9, %c0_i32_10] : memref<2x8x128xf32, #tpu.memory_space<vmem>> -> memref<1x8x128xf32, #tpu.memory_space<vmem>>
    %20 = tpu.memref_squeeze %19 : memref<1x8x128xf32, #tpu.memory_space<vmem>> -> memref<8x128xf32, #tpu.memory_space<vmem>>
    %c0_i32_11 = arith.constant 0 : i32
    %c0_i32_12 = arith.constant 0 : i32
    %21 = tpu.memref_slice %arg8[%11, %c0_i32_11, %c0_i32_12] : memref<2x8x128xf32, #tpu.memory_space<vmem>> -> memref<1x8x128xf32, #tpu.memory_space<vmem>>
    %22 = tpu.memref_squeeze %21 : memref<1x8x128xf32, #tpu.memory_space<vmem>> -> memref<8x128xf32, #tpu.memory_space<vmem>>
    %23 = tpu.memref_slice %arg9[%11] : memref<2x!tpu.dma_semaphore, #tpu.memory_space<semaphore_mem>> -> memref<1x!tpu.dma_semaphore, #tpu.memory_space<semaphore_mem>>
    %24 = tpu.memref_squeeze %23 : memref<1x!tpu.dma_semaphore, #tpu.memory_space<semaphore_mem>> -> memref<!tpu.dma_semaphore, #tpu.memory_space<semaphore_mem>>
    tpu.wait_dma2 semaphore(%24 : memref<!tpu.dma_semaphore, #tpu.memory_space<semaphore_mem>>) src(%20 : memref<8x128xf32, #tpu.memory_space<vmem>>) dst(%22 : memref<8x128xf32, #tpu.memory_space<vmem>>)
    %25 = arith.index_cast %11 : i32 to index
    %c0 = arith.constant 0 : index
    %c0_13 = arith.constant 0 : index
    %26 = vector.load %arg8[%25, %c0, %c0_13] : memref<2x8x128xf32, #tpu.memory_space<vmem>>, vector<1x8x128xf32>
    %27 = vector.shape_cast %26 : vector<1x8x128xf32> to vector<8x128xf32>
    %c0_14 = arith.constant 0 : index
    %c0_15 = arith.constant 0 : index
    %28 = vector.load %arg4[%c0_14, %c0_15] : memref<8x128xf32, #tpu.memory_space<vmem>>, vector<8x128xf32>
    %29 = arith.addf %27, %28 : vector<8x128xf32>
    %cst = arith.constant dense<0.000000e+00> : vector<8xf32>
    %30 = vector.multi_reduction <add>, %29, %cst [1] : vector<8x128xf32> to vector<8xf32>
    %31 = vector.shape_cast %30 : vector<8xf32> to vector<8x1xf32>
    %cst_16 = arith.constant 1.280000e+02 : f32
    %32 = vector.broadcast %cst_16 : f32 to vector<8x1xf32>
    %33 = arith.divf %31, %32 : vector<8x1xf32>
    %34 = vector.broadcast %33 : vector<8x1xf32> to vector<8x128xf32>
    %35 = arith.subf %29, %34 : vector<8x128xf32>
    %36 = arith.mulf %35, %35 : vector<8x128xf32>
    %cst_17 = arith.constant dense<0.000000e+00> : vector<8xf32>
    %37 = vector.multi_reduction <add>, %36, %cst_17 [1] : vector<8x128xf32> to vector<8xf32>
    %38 = vector.shape_cast %37 : vector<8xf32> to vector<8x1xf32>
    %cst_18 = arith.constant 1.280000e+02 : f32
    %39 = vector.broadcast %cst_18 : f32 to vector<8x1xf32>
    %40 = arith.divf %38, %39 : vector<8x1xf32>
    %cst_19 = arith.constant 9.99999996E-13 : f32
    %41 = vector.broadcast %cst_19 : f32 to vector<8x1xf32>
    %42 = arith.addf %40, %41 : vector<8x1xf32>
    %43 = math.rsqrt %42 : vector<8x1xf32>
    %44 = vector.broadcast %43 : vector<8x1xf32> to vector<8x128xf32>
    %45 = arith.mulf %35, %44 : vector<8x128xf32>
    %c0_20 = arith.constant 0 : index
    %c0_21 = arith.constant 0 : index
    %46 = vector.load %arg5[%c0_20, %c0_21] : memref<1x128xf32, #tpu.memory_space<vmem>>, vector<1x128xf32>
    %47 = vector.broadcast %46 : vector<1x128xf32> to vector<8x128xf32>
    %48 = arith.mulf %45, %47 : vector<8x128xf32>
    %c0_22 = arith.constant 0 : index
    %c0_23 = arith.constant 0 : index
    %49 = vector.load %arg6[%c0_22, %c0_23] : memref<1x128xf32, #tpu.memory_space<vmem>>, vector<1x128xf32>
    %50 = vector.broadcast %49 : vector<1x128xf32> to vector<8x128xf32>
    %51 = arith.addf %48, %50 : vector<8x128xf32>
    %c0_24 = arith.constant 0 : index
    %c0_25 = arith.constant 0 : index
    %c0_26 = arith.constant 0 : index
    %52 = vector.load %arg7[%c0_24, %c0_25, %c0_26] : memref<1x8x128xf32, #tpu.memory_space<vmem>>, vector<1x8x128xf32>
    %53 = vector.shape_cast %52 : vector<1x8x128xf32> to vector<8x128xf32>
    %54 = vector.shape_cast %51 : vector<8x128xf32> to vector<1x8x128xf32>
    tpu.vector_store %arg7[%c0_24, %c0_25, %c0_26], %54 {strides = array<i32>} : memref<1x8x128xf32, #tpu.memory_space<vmem>>, vector<1x8x128xf32>,
    return
  }
  func.func @transform_1(%arg0: i32, %arg1: i32, %arg2: memref<16xi32, #tpu.memory_space<smem>>) -> (i32, i32) {
    %c0_i32 = arith.constant 0 : i32
    %c0_i32_0 = arith.constant 0 : i32
    return %arg1, %c0_i32 : i32, i32
  }
  func.func @transform_2(%arg0: i32, %arg1: i32, %arg2: memref<16xi32, #tpu.memory_space<smem>>) -> (i32, i32) {
    %c0_i32 = arith.constant 0 : i32
    %c0_i32_0 = arith.constant 0 : i32
    %c0_i32_1 = arith.constant 0 : i32
    return %c0_i32, %c0_i32_0 : i32, i32
  }
  func.func @transform_3(%arg0: i32, %arg1: i32, %arg2: memref<16xi32, #tpu.memory_space<smem>>) -> (i32, i32) {
    %c0_i32 = arith.constant 0 : i32
    %c0_i32_0 = arith.constant 0 : i32
    %c0_i32_1 = arith.constant 0 : i32
    return %c0_i32, %c0_i32_0 : i32, i32
  }
  func.func @transform_4(%arg0: i32, %arg1: i32, %arg2: memref<16xi32, #tpu.memory_space<smem>>) -> (i32, i32, i32) {
    %c0_i32 = arith.constant 0 : i32
    %c0_i32_0 = arith.constant 0 : i32
    return %arg0, %arg1, %c0_i32 : i32, i32, i32
  }
}

</mosaic_0001>

<bundles_post_ra>
// kernel: tpu_custom_call.1
= control target key start
LH: loop header
LB: loop body
LE: loop exit
PB: predicated region body
PF: predicated region fallthrough
CT: control target
= control target key end

     0   :  { %s1442_s0 = inlined_call_operand.hbm [shape: s32[16], index: 0, kind: input, shape index: {}]   ;;  %s1443_s1 = inlined_call_operand.hbm [shape: f32[64,128], index: 1, kind: input, shape index: {}]   ;;  %s1444_s2 = inlined_call_operand.hbm [shape: f32[8,128], index: 2, kind: input, shape index: {}]   ;;  %s1445_s3 = inlined_call_operand.vmem [shape: f32[1,128], index: 3, kind: input, shape index: {}]   ;;  %s1446_s4 = inlined_call_operand.vmem [shape: f32[1,128], index: 4, kind: input, shape index: {}]   ;;  %s1447_s5 = inlined_call_operand.hbm [shape: f32[2,8,128], index: 5, kind: output, shape index: {}]  }
   0x1   :  { %1461 = sst [smem:[#allocation39_spill]] %s1444_s2  ;;  %s688_s20 = scalar_lea.hbm %s1442_s0, 16 }
   0x2   :  { %1462 = sst [smem:[#allocation40_spill]] %s1447_s5  ;;  %p689_p0 = scmp.ne.s32.totalorder %s1442_s0, %s688_s20 }
   0x3   :  { %p692_p1 = scmp.lt.u32.totalorder %s688_s20, %s1442_s0 }
   0x5   :  { %p694_p2 = pnand %p692_p1, %p689_p0 }
   0x7   :  { %697 = shalt.err (!%p694_p2)  }
   0x8   :  { %s1022_s25 = smov [#allocation5]  }
   0x9   :  { %11 = dma.hbm_to_smem %s1442_s0, 16, %s1022_s25, [#allocation4] }
   0xa   :  { %978 = dma.done.wait [#allocation4], 16 }
   0xb   :  { %979 = vsyncadd [#allocation4], 4294967280 }
   0xc   :  { %13 = sfence }
   0xd   :  { %14 = vsyncpa [#allocation7], 0 }
   0xe   :  { %15 = vsyncpa [#allocation8], 0 }
   0xf   :  { %17 = vsyncpa [#allocation8 + $0x1], 0  ;;  %s1069_s28 = smov 0   ;;  %s1071_s29 = smov 0  }
  0x10   :  { %s1073_s30 = smov 0   ;;  %s1075_s6 = smov 0  }
  0x11   :  { %s1077_s7 = smov 0   ;;  %s1079_s8 = smov 0  }
  0x12 LB: > { %1463 = sst [smem:[#allocation32_spill]] %s992_s28  ;;  %s559_s0 = sadd.s32 4294967295, %s1012_s8   ;;  %s1012_s8 = sphi %s1079_s8, %s23_s8   ;;  %s1008_s7 = sphi %s1077_s7, %s1490_s7   ;;  %s1004_s6 = sphi %s1075_s6, %s1489_s6   ;;  %s1000_s30 = sphi %s1073_s30, %s1488_s30   ;;  %s996_s29 = sphi %s1071_s29, %s1492_s29   ;;  %s992_s28 = sphi %s1069_s28, %s1491_s28  }
  0x13   : > { %1464 = sst [smem:[#allocation33_spill]] %s1000_s30  ;;  %s560_s9 = sadd.s32 4294967294, %s1012_s8  }
  0x14   : > { %1465 = sst [smem:[#allocation34_spill]] %s1008_s7  ;;  %s35_s10 = sadd.s32 1, %s1008_s7 }
  0x15   : > { %1466 = sst [smem:[#allocation35_spill]] %s1012_s8  ;;  %s112_s11 = sadd.s32 1, %s1000_s30 }
  0x16   : > { %p37_p3 = scmp.ge.s32.totalorder %s35_s10, 2  ;;  %p122_p4 = scmp.ne.s32.totalorder %s1000_s30, %s996_s29 }
  0x17   : > { %p123_p5 = scmp.eq.s32.totalorder %s559_s0, 1  ;;  %p128_p6 = scmp.ne.s32.totalorder %s996_s29, %s992_s28 }
  0x18   : > { %s1494_s10 = smov (%p37_p3, %s35_s10), 0  ;;  %p129_p8 = scmp.eq.s32.totalorder %s560_s9, 1 }
  0x19   : > { %1467 = sst [smem:[#allocation36_spill]] %s1494_s10  ;;  %p1109_p7 = por %p123_p5, %p122_p4 }
  0x1a   : > { %s107_s13 = ssub.s32 %s1008_s7, %s1494_s10  ;;  %p561_p9 = scmp.ge.s32.totalorder %s1012_s8, 1 }
  0x1b   : > { %s1468_s12 = scalar_select %p1109_p7, 1, 0 }
  0x1c   : > { %p110_p10 = scmp.eq.s32.totalorder %s107_s13, 0  ;;  %p1116_p11 = por %p129_p8, %p128_p6 }
  0x1d   : > { %p136_p12 = scmp.lt.s32.totalorder %s1012_s8, 3  ;;  %p1128_p0 = scmp.eq.s32.totalorder %s559_s0, 0 }
  0x1e   : > { %s1469_s14 = scalar_select %p1116_p11, 1, 0 }
  0x1f   : > { %s1122_s15 = scalar_select %p110_p10, %s1000_s30, %s112_s11  }
  0x20   : > { %1470 = sst [smem:[#allocation37_spill]] %s1469_s14  ;;  %p1124_p13 = pnand %p561_p9, %p136_p12 }
  0x21   : > { %1471 = sst [smem:[#allocation38_spill]] %s1122_s15  ;;  %s1023_s18 = smov [#allocation6]  }
  0x22   : > { %s1472_s16 = scalar_select %p1124_p13, 1, 0 }
  0x23   : > { %s1473_s17 = scalar_select %p1128_p0, 1, 0 }
  0x24   : > { %p609_p1 = pneg %p1124_p13  ;;  %s151_s19 = sshll.u32 %s1023_s18, 4  ;;  %s152_s19 = int_to_ptr.vmem [resolvable:$true] %s151_s19 }
  0x25   : > { %s1475_s2 = sld [smem:[#allocation39_spill]] }
  0x26   : > { %p1136_p2 = pnand %p1128_p0, %p609_p1 }
  0x28   : > { %p700_p4 = pneg %p1136_p2 }
  0x2b   : > { %s698_s23 = scalar_lea.hbm %s1475_s2, 128 }
  0x2c   : > { %p699_p3 = scmp.ne.s32.totalorder %s1475_s2, %s698_s23  ;;  %p705_p8 = scmp.lt.u32.totalorder %s698_s23, %s1475_s2 }
  0x2e   : > { %p701_p5 = pnand %p700_p4, %p699_p3 }
  0x30   : > { %p702_p6 = pneg %p701_p5 }
  0x32   : > { %p707_p9 = pnand %p705_p8, %p702_p6 }
  0x34   : > { %710 = shalt.err (!%p707_p9)
}
  0x35   : > { %s711_s0 = scalar_lea.vmem %s152_s19, 128  ;;  %p719_p11 = scmp.lt.s32.totalorder %s152_s19, %s152_s19 }
  0x36   : > { %p712_p10 = scmp.ne.s32.totalorder %s152_s19, %s711_s0  ;;  %p720_p7 = scmp.lt.s32.totalorder %s711_s0, %s711_s0 }
  0x38   : > { %p714_p12 = pnand %p712_p10, %p700_p4  ;;  %p721_p0 = por %p720_p7, %p719_p11 }
  0x3a   : > { %p715_p1 = pneg %p714_p12 }
  0x3c   : > { %p722_p13 = pnand %p721_p0, %p715_p1 }
  0x3e   : > { %725 = shalt.err (!%p722_p13)
}
  0x3f   : > { %612 = dma.hbm_to_vmem [thread:$0]  (!%p1136_p2), %s1475_s2, 128, %s152_s19, [#allocation7]  }
  0x40   : > { %p1476_p3 = scmp.ne.s32.totalorder %s1472_s16, 0 }
  0x41   : > { %p1477_p5 = scmp.ne.s32.totalorder (!%p1476_p3), %s1473_s17, 0 }
  0x42   : > { %170 = sbr.rel (%p1476_p3) target bundleno = 638 (0x27e), region = 32 }
  0x49   : > { %981 = dma.done.wait (%p1477_p5), [#allocation7], 128  }
  0x4a   : > { %983 = vsyncadd (%p1477_p5), [#allocation7], 4294967168  ;;  %s1452_s13 = sand.u32 1, %s996_s29   ;;  %p190_p7 = scmp.lt.s32.totalorder %s1004_s6, 0 }
  0x4b   : > { %s1166_s18 = sshll.u32 %s1452_s13, 3  ;;  %s191_s19 = ssub.s32 0, %s1004_s6 }
  0x4c   : > { %s566_s16 = smin.u32 %s1004_s6, %s191_s19  ;;  %p569_p13 = scmp.ne.s32.totalorder %s1004_s6, 0 }
  0x4d   : > { %s193_s20 = sand.u32 1, %s566_s16   ;;  %s1174_s23 = smov (!%p569_p13), 0  }
  0x4e   : > { %s194_s21 = ssub.s32 0, %s193_s20  ;;  %205 = sbr.rel (%p569_p13) target bundleno = 187 (0xbb), region = 40 }
  0x4f   : > { %s1496_s21 = smov (!%p190_p7, %s194_s21), %s193_s20 }
  0x50   : > { %p568_p11 = scmp.lt.s32.totalorder %s1496_s21, 0  ;;  %s200_s22 = sadd.s32 2, %s1496_s21 }
  0x52   : > { %s1498_s22 = smov (!%p568_p11, %s200_s22), %s1496_s21 }
  0x55 LB: >> { %s1180_s24 = sshll.u32 %s1016_s23, 2  ;;  %s1207_s14 = scalar_lea.hbm %s1443_s1, 1024  ;;  %s1016_s23 = sphi %s1174_s23, %s211_s23  }
  0x56   : >> { %s213_s25 = sld [smem:[#allocation5 + %s1180_s24]]  ;;  %s1184_s26 = scalar_lea.vmem [#allocation2], %s1180_s24 }
  0x57   : >> { %s224_s27 = sshll.u32 %s1184_s26, 4  ;;  %s228_s0 = sadd.s32 1, %s1180_s24  ;;  %s1188_s27 = int_to_ptr.vmem [resolvable:$true] %s224_s27 }
  0x58   : >> { %s1190_s9 = sld [smem:[#allocation5 + %s228_s0]]  ;;  %s466_s11 = scalar_lea.vmem %s1184_s26, 1 [#allocation2] }
  0x59   : >> { %s244_s19 = sadd.s32 2, %s1180_s24  ;;  %s240_s16 = sshll.u32 %s466_s11, 4  ;;  %s1196_s16 = int_to_ptr.vmem [resolvable:$true] %s240_s16 }
  0x5a   : >> { %s1194_s20 = sld [smem:[#allocation5 + %s244_s19]]  ;;  %s471_s21 = scalar_lea.vmem %s1184_s26, 2 [#allocation2] }
  0x5b   : >> { %s256_s17 = sshll.u32 %s471_s21, 4  ;;  %s1202_s17 = int_to_ptr.vmem [resolvable:$true] %s256_s17 }
  0x5c   : >> { %s571_s13 = sshll.u32 %s213_s25, 4 }
  0x5d   : >> { %s215_s7 = scalar_lea.hbm %s1443_s1, %s571_s13 }
  0x5e   : >> { %s726_s15 = scalar_lea.hbm %s215_s7, 16  ;;  %p729_p2 = scmp.lt.u32.totalorder %s215_s7, %s1443_s1 }
  0x5f   : >> { %p727_p0 = scmp.ne.s32.totalorder %s215_s7, %s726_s15  ;;  %p730_p4 = scmp.lt.u32.totalorder %s1207_s14, %s726_s15 }
  0x60   : >> { %p732_p8 = scmp.lt.u32.totalorder %s726_s15, %s215_s7 }
  0x61   : >> { %p731_p6 = por %p730_p4, %p729_p2 }
  0x63   : >> { %p733_p9 = por %p732_p8, %p731_p6 }
  0x65   : >> { %p734_p10 = pnand %p733_p9, %p727_p0 }
  0x67   : >> { %737 = shalt.err (!%p734_p10)  }
  0x68   : >> { %s738_s2 = scalar_lea.vmem %s1188_s27, 16  ;;  %s1024_s10 = smov [#allocation2]  }
  0x69   : >> { %p739_p12 = scmp.ne.s32.totalorder %s1188_s27, %s738_s2  ;;  %s740_s30 = sshll.u32 %s1024_s10, 4  ;;  %s1215_s30 = int_to_ptr.vmem [resolvable:$false] %s740_s30 }
  0x6a   : >> { %s1218_s13 = scalar_lea.vmem %s1215_s30, 256  ;;  %p743_p1 = scmp.lt.s32.totalorder %s1188_s27, %s1215_s30 }
  0x6b   : >> { %p744_p3 = scmp.lt.s32.totalorder %s1218_s13, %s738_s2 }
  0x6d   : >> { %p745_p5 = por %p744_p3, %p743_p1 }
  0x6f   : >> { %p746_p7 = pnand %p745_p5, %p739_p12 }
  0x71   : >> { %749 = shalt.err (!%p746_p7)  }
  0x72   : >> { %227 = dma.hbm_to_vmem [thread:$0]  %s215_s7, 16, %s1188_s27, [#allocation3] }
  0x73   : >> { %s572_s15 = sshll.u32 %s1190_s9, 4  ;;  %s260_s25 = sadd.s32 3, %s1180_s24 }
  0x74   : >> { %s231_s11 = scalar_lea.hbm %s1443_s1, %s572_s15  ;;  %s574_s19 = sshll.u32 %s1194_s20, 4 }
  0x75   : >> { %s750_s10 = scalar_lea.hbm %s231_s11, 16  ;;  %p753_p13 = scmp.lt.u32.totalorder %s231_s11, %s1443_s1 }
  0x76   : >> { %p751_p11 = scmp.ne.s32.totalorder %s231_s11, %s750_s10  ;;  %p754_p0 = scmp.lt.u32.totalorder %s1207_s14, %s750_s10 }
  0x77   : >> { %p756_p4 = scmp.lt.u32.totalorder %s750_s10, %s231_s11 }
  0x78   : >> { %p755_p2 = por %p754_p0, %p753_p13 }
  0x7a   : >> { %p757_p6 = por %p756_p4, %p755_p2 }
  0x7c   : >> { %p758_p8 = pnand %p757_p6, %p751_p11 }
  0x7e   : >> { %761 = shalt.err (!%p758_p8)  }
  0x7f   : >> { %s762_s7 = scalar_lea.vmem %s1196_s16, 16  ;;  %p767_p10 = scmp.lt.s32.totalorder %s1196_s16, %s1215_s30 }
  0x80   : >> { %p763_p9 = scmp.ne.s32.totalorder %s1196_s16, %s762_s7  ;;  %p768_p12 = scmp.lt.s32.totalorder %s1218_s13, %s762_s7 }
  0x82   : >> { %p769_p1 = por %p768_p12, %p767_p10 }
  0x84   : >> { %p770_p3 = pnand %p769_p1, %p763_p9 }
  0x86   : >> { %773 = shalt.err (!%p770_p3)  }
  0x87   : >> { %243 = dma.hbm_to_vmem [thread:$0]  %s231_s11, 16, %s1196_s16, [#allocation3] }
  0x88   : >> { %s247_s27 = scalar_lea.hbm %s1443_s1, %s574_s19  ;;  %s261_s9 = sld [smem:[#allocation5 + %s260_s25]] }
  0x89   : >> { %s774_s20 = scalar_lea.hbm %s247_s27, 16  ;;  %p777_p7 = scmp.lt.u32.totalorder %s247_s27, %s1443_s1 }
  0x8a   : >> { %p775_p5 = scmp.ne.s32.totalorder %s247_s27, %s774_s20  ;;  %p778_p11 = scmp.lt.u32.totalorder %s1207_s14, %s774_s20 }
  0x8b   : >> { %p780_p0 = scmp.lt.u32.totalorder %s774_s20, %s247_s27 }
  0x8c   : >> { %p779_p13 = por %p778_p11, %p777_p7 }
  0x8e   : >> { %p781_p2 = por %p780_p0, %p779_p13 }
  0x90   : >> { %p782_p4 = pnand %p781_p2, %p775_p5 }
  0x92   : >> { %785 = shalt.err (!%p782_p4)  }
  0x93   : >> { %s786_s16 = scalar_lea.vmem %s1202_s17, 16  ;;  %p791_p8 = scmp.lt.s32.totalorder %s1202_s17, %s1215_s30 }
  0x94   : >> { %p787_p6 = scmp.ne.s32.totalorder %s1202_s17, %s786_s16  ;;  %p792_p9 = scmp.lt.s32.totalorder %s1218_s13, %s786_s16 }
  0x96   : >> { %p793_p10 = por %p792_p9, %p791_p8 }
  0x98   : >> { %p794_p12 = pnand %p793_p10, %p787_p6 }
  0x9a   : >> { %797 = shalt.err (!%p794_p12)  }
  0x9b   : >> { %259 = dma.hbm_to_vmem [thread:$0]  %s247_s27, 16, %s1202_s17, [#allocation3] }
  0x9c   : >> { %s476_s25 = scalar_lea.vmem %s1184_s26, 3 [#allocation2]  ;;  %s576_s11 = sshll.u32 %s261_s9, 4 }
  0x9d   : >> { %s272_s0 = sshll.u32 %s476_s25, 4  ;;  %s263_s2 = scalar_lea.hbm %s1443_s1, %s576_s11  ;;  %s273_s0 = int_to_ptr.vmem [resolvable:$true] %s272_s0 }
  0x9e   : >> { %s798_s7 = scalar_lea.hbm %s263_s2, 16  ;;  %p801_p3 = scmp.lt.u32.totalorder %s263_s2, %s1443_s1 }
  0x9f   : >> { %p799_p1 = scmp.ne.s32.totalorder %s263_s2, %s798_s7  ;;  %p802_p5 = scmp.lt.u32.totalorder %s1207_s14, %s798_s7 }
  0xa0   : >> { %p804_p11 = scmp.lt.u32.totalorder %s798_s7, %s263_s2 }
  0xa1   : >> { %p803_p7 = por %p802_p5, %p801_p3 }
  0xa3   : >> { %p805_p13 = por %p804_p11, %p803_p7 }
  0xa5   : >> { %p806_p0 = pnand %p805_p13, %p799_p1 }
  0xa7   : >> { %809 = shalt.err (!%p806_p0)  }
  0xa8   : >> { %s810_s17 = scalar_lea.vmem %s273_s0, 16  ;;  %p815_p4 = scmp.lt.s32.totalorder %s273_s0, %s1215_s30 }
  0xa9   : >> { %p811_p2 = scmp.ne.s32.totalorder %s273_s0, %s810_s17  ;;  %p816_p6 = scmp.lt.s32.totalorder %s1218_s13, %s810_s17 }
  0xab   : >> { %p817_p8 = por %p816_p6, %p815_p4 }
  0xad   : >> { %p818_p9 = pnand %p817_p8, %p811_p2 }
  0xaf   : >> { %821 = shalt.err (!%p818_p9)  }
  0xb0   : >> { %275 = dma.hbm_to_vmem [thread:$0]  %s263_s2, 16, %s273_s0, [#allocation3] }
  0xb1   : >> { %s211_s23 = sadd.s32 1, %s1016_s23  }
  0xb2   : >> { %p208_p10 = scmp.ge.s32.totalorder %s211_s23, 2  }
  0xb4   : > { %210 = sbr.rel (!%p208_p10) target bundleno = 85 (0x55), region = 144 }
  0xbb PF: > { %s276_s14 = sadd.s32 1, %s1004_s6 }
  0xbc   : > { %p578_p12 = scmp.ge.s32.totalorder %s276_s14, 2 }
  0xbd   : > { %s281_s26 = ssub.s32 (!%p578_p12), 1, %s1498_s22  ;;  %s601_s30 = sshll.u32 (!%p578_p12), %s1004_s6, 3 }
  0xbe   : > { %280 = sbr.rel (%p578_p12) target bundleno = 307 (0x133), region = 67  ;;  %s1269_s13 = sadd.s32 (!%p578_p12), 8, %s601_s30 }
  0xbf   : > { %s1271_s27 = smov (!%p578_p12), 0  }
  0xc5 LB: >> { %s582_s23 = sshll.u32 %s281_s26, 3  ;;  %s1279_s9 = sshll.u32 %s1020_s27, 2  ;;  %s1020_s27 = sphi %s1271_s27, %s288_s27  }
  0xc6   : >> { %s290_s20 = sadd.s32 %s1269_s13, %s1279_s9  ;;  %s295_s15 = sadd.s32 %s582_s23, %s1279_s9 }
  0xc7   : >> { %s291_s21 = sld [smem:[#allocation5 + %s290_s20]]  ;;  %s1284_s16 = scalar_lea.vmem [#allocation2], %s295_s15 }
  0xc8   : >> { %s305_s25 = sshll.u32 %s1284_s16, 4  ;;  %s309_s0 = sadd.s32 1, %s1279_s9  ;;  %s1288_s25 = int_to_ptr.vmem [resolvable:$true] %s305_s25 }
  0xc9   : >> { %s310_s11 = sadd.s32 %s1269_s13, %s309_s0  ;;  %s490_s10 = scalar_lea.vmem %s1284_s16, 1 [#allocation2] }
  0xca   : >> { %s1291_s19 = sld [smem:[#allocation5 + %s310_s11]]  ;;  %s323_s2 = sshll.u32 %s490_s10, 4  ;;  %s1295_s2 = int_to_ptr.vmem [resolvable:$true] %s323_s2 }
  0xcb   : >> { %s327_s7 = sadd.s32 2, %s1279_s9  ;;  %s497_s20 = scalar_lea.vmem %s1284_s16, 2 [#allocation2] }
  0xcc   : >> { %s328_s28 = sadd.s32 %s1269_s13, %s327_s7  ;;  %s1306_s15 = scalar_lea.sflag [#allocation3], %s281_s26 }
  0xcd   : >> { %s581_s24 = sshll.u32 %s291_s21, 4  ;;  %s1298_s17 = sld [smem:[#allocation5 + %s328_s28]] }
  0xce   : >> { %s293_s23 = scalar_lea.hbm %s1443_s1, %s581_s24  ;;  %s1311_s10 = scalar_lea.hbm %s1443_s1, 1024 }
  0xcf   : >> { %s822_s0 = scalar_lea.hbm %s293_s23, 16  ;;  %p825_p3 = scmp.lt.u32.totalorder %s293_s23, %s1443_s1 }
  0xd0   : >> { %p823_p1 = scmp.ne.s32.totalorder %s293_s23, %s822_s0  ;;  %p826_p5 = scmp.lt.u32.totalorder %s1311_s10, %s822_s0 }
  0xd1   : >> { %p828_p11 = scmp.lt.u32.totalorder %s822_s0, %s293_s23 }
  0xd2   : >> { %p827_p7 = por %p826_p5, %p825_p3 }
  0xd4   : >> { %p829_p13 = por %p828_p11, %p827_p7 }
  0xd6   : >> { %p830_p0 = pnand %p829_p13, %p823_p1 }
  0xd8   : >> { %833 = shalt.err (!%p830_p0)  }
  0xd9   : >> { %s834_s21 = scalar_lea.vmem %s1288_s25, 16  ;;  %s1025_s28 = smov [#allocation2]  }
  0xda   : >> { %p835_p2 = scmp.ne.s32.totalorder %s1288_s25, %s834_s21  ;;  %s836_s8 = sshll.u32 %s1025_s28, 4  ;;  %s1319_s8 = int_to_ptr.vmem [resolvable:$false] %s836_s8 }
  0xdb   : >> { %s1322_s5 = scalar_lea.vmem %s1319_s8, 256  ;;  %p839_p4 = scmp.lt.s32.totalorder %s1288_s25, %s1319_s8 }
  0xdc   : >> { %p840_p6 = scmp.lt.s32.totalorder %s1322_s5, %s834_s21 }
  0xde   : >> { %p841_p8 = por %p840_p6, %p839_p4 }
  0xe0   : >> { %p842_p9 = pnand %p841_p8, %p835_p2 }
  0xe2   : >> { %845 = shalt.err (!%p842_p9)  }
  0xe3   : >> { %308 = dma.hbm_to_vmem [thread:$0]  %s293_s23, 16, %s1288_s25, %s1306_s15 }
  0xe4   : >> { %s583_s24 = sshll.u32 %s1291_s19, 4  ;;  %s341_s14 = sshll.u32 %s497_s20, 4  ;;  %s1333_s14 = int_to_ptr.vmem [resolvable:$true] %s341_s14 }
  0xe5   : >> { %s313_s11 = scalar_lea.hbm %s1443_s1, %s583_s24 }
  0xe6   : >> { %s846_s7 = scalar_lea.hbm %s313_s11, 16  ;;  %p849_p12 = scmp.lt.u32.totalorder %s313_s11, %s1443_s1 }
  0xe7   : >> { %p847_p10 = scmp.ne.s32.totalorder %s313_s11, %s846_s7  ;;  %p850_p1 = scmp.lt.u32.totalorder %s1311_s10, %s846_s7 }
  0xe8   : >> { %p852_p5 = scmp.lt.u32.totalorder %s846_s7, %s313_s11 }
  0xe9   : >> { %p851_p3 = por %p850_p1, %p849_p12 }
  0xeb   : >> { %p853_p7 = por %p852_p5, %p851_p3 }
  0xed   : >> { %p854_p11 = pnand %p853_p7, %p847_p10 }
  0xef   : >> { %857 = shalt.err (!%p854_p11)  }
  0xf0   : >> { %s858_s25 = scalar_lea.vmem %s1295_s2, 16  ;;  %p863_p0 = scmp.lt.s32.totalorder %s1295_s2, %s1319_s8 }
  0xf1   : >> { %p859_p13 = scmp.ne.s32.totalorder %s1295_s2, %s858_s25  ;;  %p864_p2 = scmp.lt.s32.totalorder %s1322_s5, %s858_s25 }
  0xf3   : >> { %p865_p4 = por %p864_p2, %p863_p0 }
  0xf5   : >> { %p866_p6 = pnand %p865_p4, %p859_p13 }
  0xf7   : >> { %869 = shalt.err (!%p866_p6)  }
  0xf8   : >> { %326 = dma.hbm_to_vmem [thread:$0]  %s313_s11, 16, %s1295_s2, %s1306_s15 }
  0xf9   : >> { %s586_s19 = sshll.u32 %s1298_s17, 4  ;;  %s345_s23 = sadd.s32 3, %s1279_s9 }
  0xfa   : >> { %s331_s30 = scalar_lea.hbm %s1443_s1, %s586_s19  ;;  %s346_s0 = sadd.s32 %s1269_s13, %s345_s23 }
  0xfb   : >> { %s870_s7 = scalar_lea.hbm %s331_s30, 16  ;;  %p873_p9 = scmp.lt.u32.totalorder %s331_s30, %s1443_s1 }
  0xfc   : >> { %p871_p8 = scmp.ne.s32.totalorder %s331_s30, %s870_s7  ;;  %p874_p10 = scmp.lt.u32.totalorder %s1311_s10, %s870_s7 }
  0xfd   : >> { %p876_p1 = scmp.lt.u32.totalorder %s870_s7, %s331_s30 }
  0xfe   : >> { %p875_p12 = por %p874_p10, %p873_p9 }
 0x100   : >> { %p877_p3 = por %p876_p1, %p875_p12 }
 0x102   : >> { %p878_p5 = pnand %p877_p3, %p871_p8 }
 0x104   : >> { %881 = shalt.err (!%p878_p5)  }
 0x105   : >> { %s882_s9 = scalar_lea.vmem %s1333_s14, 16  ;;  %p887_p11 = scmp.lt.s32.totalorder %s1333_s14, %s1319_s8 }
 0x106   : >> { %p883_p7 = scmp.ne.s32.totalorder %s1333_s14, %s882_s9  ;;  %p888_p13 = scmp.lt.s32.totalorder %s1322_s5, %s882_s9 }
 0x108   : >> { %p889_p0 = por %p888_p13, %p887_p11 }
 0x10a   : >> { %p890_p2 = pnand %p889_p0, %p883_p7 }
 0x10c   : >> { %893 = shalt.err (!%p890_p2)  }
 0x10d   : >> { %344 = dma.hbm_to_vmem [thread:$0]  %s331_s30, 16, %s1333_s14, %s1306_s15 }
 0x10e   : >> { %s347_s2 = sld [smem:[#allocation5 + %s346_s0]]  ;;  %s504_s17 = scalar_lea.vmem %s1284_s16, 3 [#allocation2] }
 0x10f   : >> { %s359_s11 = sshll.u32 %s504_s17, 4  ;;  %s360_s11 = int_to_ptr.vmem [resolvable:$true] %s359_s11 }
 0x114   : >> { %s589_s25 = sshll.u32 %s347_s2, 4 }
 0x115   : >> { %s349_s20 = scalar_lea.hbm %s1443_s1, %s589_s25 }
 0x116   : >> { %s894_s24 = scalar_lea.hbm %s349_s20, 16  ;;  %p897_p6 = scmp.lt.u32.totalorder %s349_s20, %s1443_s1 }
 0x117   : >> { %p895_p4 = scmp.ne.s32.totalorder %s349_s20, %s894_s24  ;;  %p898_p8 = scmp.lt.u32.totalorder %s1311_s10, %s894_s24 }
 0x118   : >> { %p900_p10 = scmp.lt.u32.totalorder %s894_s24, %s349_s20 }
 0x119   : >> { %p899_p9 = por %p898_p8, %p897_p6 }
 0x11b   : >> { %p901_p12 = por %p900_p10, %p899_p9 }
 0x11d   : >> { %p902_p1 = pnand %p901_p12, %p895_p4 }
 0x11f   : >> { %905 = shalt.err (!%p902_p1)  }
 0x120   : >> { %s906_s16 = scalar_lea.vmem %s360_s11, 16  ;;  %p911_p5 = scmp.lt.s32.totalorder %s360_s11, %s1319_s8 }
 0x121   : >> { %p907_p3 = scmp.ne.s32.totalorder %s360_s11, %s906_s16  ;;  %p912_p7 = scmp.lt.s32.totalorder %s1322_s5, %s906_s16 }
 0x123   : >> { %p913_p11 = por %p912_p7, %p911_p5 }
 0x125   : >> { %p914_p13 = pnand %p913_p11, %p907_p3 }
 0x127   : >> { %917 = shalt.err (!%p914_p13)  }
 0x128   : >> { %362 = dma.hbm_to_vmem [thread:$0]  %s349_s20, 16, %s360_s11, %s1306_s15 }
 0x129   : >> { %s288_s27 = sadd.s32 1, %s1020_s27  }
 0x12a   : >> { %p285_p0 = scmp.ge.s32.totalorder %s288_s27, 2  }
 0x12c   : > { %287 = sbr.rel (!%p285_p0) target bundleno = 197 (0xc5), region = 155 }
 0x133 PF: > { %s592_s10 = sshll.u32 %s1498_s22, 3  ;;  %s365_s30 = scalar_lea.sflag [#allocation3], %s1498_s22 }
 0x134   : > { %s364_s14 = scalar_lea.vmem [#allocation2], %s592_s10 }
 0x135   : > { %984 = dma.done.wait %s365_s30, 128 }
 0x136   : > { %985 = vsyncadd %s365_s30, 4294967168  ;;  %v369_v0 = vld [vmem:[%s364_s14] sm:$0xff]  ;;  %v370_v1 = vld [vmem:[#allocation6] sm:$0xff]  ;;  %s596_s15 = sshll.u32 %s1004_s6, 7  ;;  %s1478_s8 = scalar_lea.vmem [#allocation9], %s1166_s18 }
 0x137   : > { %v371_v2 = vadd.f32 %v370_v1, %v369_v0  ;;  %v593_v11 = vld [vmem:[%s1445_s3] ss:$0 sm:$0xff]  ;;  %s416_s5 = sshll.u32 %s1478_s8, 4  ;;  %s1479_s9 = sld [smem:[#allocation40_spill]]  ;;  %s1393_s5 = int_to_ptr.vmem [resolvable:$true] %s416_s5 }
 0x138   : > { %v594_v13 = vld [vmem:[%s1446_s4] ss:$0 sm:$0xff]  ;;  %s1480_s17 = smov %s1478_s8  ;;  %s1481_s11 = sand.u32 1, %s996_s29  }
 0x139   : > { %372 = vadd.xlane.f32.xlu0 %v371_v2  ;;  %s402_s25 = scalar_lea.sflag [#allocation8], %s1481_s11  ;;  %s918_s19 = scalar_lea.vmem %s1393_s5, 128 }
 0x13a   : > { %p919_p2 = scmp.ne.s32.totalorder %s1393_s5, %s918_s19  ;;  %p1482_p4 = scmp.ne.s32.totalorder %s1468_s12, 0 }
 0x13b   : > { %s1026_s6 = smov [#allocation9]  }
 0x13c   : > { %p920_p6 = pnand %p919_p2, %p1482_p4  ;;  %s922_s23 = sshll.u32 %s1026_s6, 4  ;;  %s923_s23 = int_to_ptr.vmem [resolvable:$false] %s922_s23 }
 0x13d   : > { %s1391_s2 = scalar_lea.hbm %s1479_s9, %s596_s15  ;;  %s924_s20 = scalar_lea.vmem %s923_s23, 256 }
 0x13e   : > { %p921_p8 = pneg %p920_p6  ;;  %p925_p9 = scmp.lt.s32.totalorder %s1393_s5, %s923_s23 }
 0x13f   : > { %p926_p10 = scmp.lt.s32.totalorder %s924_s20, %s918_s19 }
 0x141   : > { %p927_p12 = por %p926_p10, %p925_p9 }
 0x143   : > { %p928_p1 = pnand %p927_p12, %p921_p8 }
 0x1c6   : > { %v373_v3 = vpop.xlane.xlu0 %372 }
 0x1c7   : > { %v375_v4 = vmul.f32 0.0078125, %v373_v3 }
 0x1c9   : > { %v376_v5 = vsub.f32 %v371_v2, %v375_v4 }
 0x1cb   : > { %v377_v6 = vmul.f32 %v376_v5, %v376_v5 }
 0x1cd   : > { %378 = vadd.xlane.f32.xlu0 %v377_v6 }
 0x25a   : > { %v379_v7 = vpop.xlane.xlu0 %378 }
 0x25b   : > { %v380_v8 = vmul.f32 0.0078125, %v379_v7 }
 0x25d   : > { %v381_v9 = vadd.f32 1e-12, %v380_v8 }
 0x25f   : > { %686 = vrsqrt.f32 %v381_v9 }
 0x269   : > { %v687_v10 = vpop.eup %686 }
 0x26a   : > { %v383_v12 = vmul.f32 %v687_v10, %v376_v5 }
 0x26c   : > { %v391_v14 = vmul.f32 %v593_v11, %v383_v12 }
 0x26e   : > { %v399_v15 = vadd.f32 %v594_v13, %v391_v14 }
 0x270   : > { %400 = vst [vmem:[%s1480_s17] sm:$0xff] %v399_v15 }
 0x271   : > { %931 = shalt.err (!%p928_p1)
}
 0x272   : > { %s932_s18 = scalar_lea.hbm %s1391_s2, 128  ;;  %s936_s28 = scalar_lea.hbm %s1479_s9, 256 }
 0x273   : > { %p933_p3 = scmp.ne.s32.totalorder %s1391_s2, %s932_s18  ;;  %p937_p11 = scmp.lt.u32.totalorder %s1391_s2, %s1479_s9 }
 0x274   : > { %p938_p13 = scmp.lt.u32.totalorder %s936_s28, %s932_s18  ;;  %p940_p2 = scmp.lt.u32.totalorder %s932_s18, %s1391_s2 }
 0x275   : > { %p934_p5 = pnand %p933_p3, %p1482_p4 }
 0x276   : > { %p939_p0 = por %p938_p13, %p937_p11 }
 0x277   : > { %p935_p7 = pneg %p934_p5 }
 0x278   : > { %p941_p6 = por %p940_p2, %p939_p0 }
 0x27a   : > { %p942_p8 = pnand %p941_p6, %p935_p7 }
 0x27c   : > { %945 = shalt.err (!%p942_p8)
}
 0x27d   : > { %607 = dma.vmem_to_hbm [thread:$0]  (%p1482_p4), %s1393_s5, 128, %s1391_s2, %s402_s25  }
 0x27e PF: > { %s1483_s14 = sld [smem:[#allocation35_spill]]  ;;  %s1484_s30 = sld [smem:[#allocation32_spill]] }
 0x27f   : > { %s1485_s22 = sld [smem:[#allocation37_spill]] }
 0x284   : > { %p619_p9 = scmp.ge.s32.totalorder %s1483_s14, 2  ;;  %s428_s26 = sand.u32 1, %s1484_s30  }
 0x285   : > { %p1486_p10 = scmp.ne.s32.totalorder %s1485_s22, 0  ;;  %s429_s13 = scalar_lea.sflag [#allocation8], %s428_s26 }
 0x287   : > { %p614_p12 = pnand %p619_p9, %p1486_p10 }
 0x289   : > { %987 = dma.done.wait (!%p614_p12), %s429_s13, 128  }
 0x28a   : > { %989 = vsyncadd (!%p614_p12), %s429_s13, 4294967168  ;;  %s23_s8 = sadd.s32 1, %s1483_s14   ;;  %s1487_s27 = sld [smem:[#allocation33_spill]] }
 0x28b   : > { %p20_p1 = scmp.ge.s32.totalorder %s23_s8, 4   ;;  %s1488_s30 = sld [smem:[#allocation38_spill]] }
 0x28c   : > { %s1489_s6 = sld [smem:[#allocation34_spill]]  ;;  %s1490_s7 = sld [smem:[#allocation36_spill]] }
 0x28d   : > { %s1491_s28 = smov %s996_s29  ;;  %22 = sbr.rel (!%p20_p1) target bundleno = 18 (0x12), region = 166 }
 0x290   : > { %s1492_s29 = smov %s1487_s27 }
 0x294   :  { %434 = vsyncpa [#allocation7], 1 }
 0x295   :  { %436 = vsyncpa [#allocation7 + $0x1], 1 }
 0x296   :  { %437 = vsyncpa [#allocation8], 1 }
 0x297   :  { %439 = vsyncpa [#allocation8 + $0x1], 1 }
 0x298   :  { %440 = vsyncmov [#allocation3] }
 0x29b   :  { %s441_s12 = vpop.sfrf %440 }
 0x29c   :  { %p599_p4 = scmp.ne.s32.totalorder %s441_s12, 0 }
 0x29e   :  { %445 = shalt.err (%p599_p4)  }
 0x29f   :  { %447 = vsyncmov [#allocation3 + $0x1] }
 0x2a2   :  { %s448_s15 = vpop.sfrf %447 }
 0x2a3   :  { %p600_p3 = scmp.ne.s32.totalorder %s448_s15, 0 }
 0x2a5   :  { %452 = shalt.err (%p600_p3)  }

</bundles_post_ra>
